<compile_context>
chip_gen: v7x
topology: tpu7x:2x2x1
jax: 0.10.0
libtpu: 0.0.40
codegen_flags: <defaults>
</compile_context>

<pallas_src>
import functools

import jax
import jax.numpy as jnp
from jax import lax
from jax.experimental import pallas as pl
from jax.experimental.pallas import tpu as pltpu


MIB = 1024 * 1024

# PyTorch stacks gates (i, f, g, o).  We reorder to (i, f, o, g) so one sigmoid
# covers a contiguous 3*Hp-lane slab and tanh covers the trailing Hp block.
_GATE_PERM = (0, 1, 3, 2)


# ------------------------------- helpers ------------------------------------

def _round_up(x, m):
    return (x + m - 1) // m * m


def _pick_tile(n, candidates):
    for c in candidates:
        if n % c == 0:
            return c
    return n  # full-extent block is always legal


def _pick_time_chunk(t):
    """~16-32 steps per chunk at real sizes; prefer >=2 chunks so the carry
    across grid steps and the zx/out streaming are actually exercised."""
    for c in (32, 16, 8, 4, 2, 1):
        if c <= t and t % c == 0 and t // c >= 2:
            return c
    return t


def _vmem_limit_bytes(*block_bytes):
    """Size the scoped VMEM limit to the actual blocks (each double-buffered by
    the pipeline), with 2x headroom + slack, capped below v7x's 64 MiB physical
    VMEM (always safe on v5e/v6e which have 128 MiB)."""
    need = 2 * 2 * sum(block_bytes) + 4 * MIB
    return int(min(max(need, 16 * MIB), 48 * MIB))


def _pad_gates(w, h, hp):
    """(K, 4h) -> (K, 4hp): reorder gates (i,f,g,o)->(i,f,o,g), zero-pad each
    gate block to hp lanes.  Zero padding keeps padded hidden lanes exactly at
    h = c = 0 given zero initial state (padded z lanes are 0 -> f=i=o=0.5,
    g=tanh(0)=0 -> c,h stay 0)."""
    k = w.shape[0]
    g = w.reshape(k, 4, h)[:, _GATE_PERM, :]
    return jnp.pad(g, ((0, 0), (0, 0), (0, hp - h))).reshape(k, 4 * hp)


# ----------------------------- Pallas kernels --------------------------------

def input_proj_kernel(x_ref, wih_ref, b_ref, zx_ref):
    """Hoisted input projection chunk: (rows, E) @ (E, 4Hp) + bias -> bf16."""
    zx_ref[...] = (
        jnp.dot(x_ref[...], wih_ref[...], preferred_element_type=jnp.float32)
        + b_ref[...]
    ).astype(zx_ref.dtype)


def lstm_chunk_kernel(zx_ref, whh_ref, out_ref, h_ref, c_ref, *, tc, bp):
    """LSTM recurrence over one time chunk.

    zx_ref:  (Tc*Bp, 4Hp) bf16  precomputed x@Wih + b for this chunk
    whh_ref: (Hp, 4Hp)    bf16  recurrent weight (constant block, DMA'd once)
    out_ref: (Tc*Bp, Hp)  bf16  hidden state for every step of the chunk
    h_ref/c_ref: (Bp, Hp) f32   VMEM scratch, persists across grid steps
    """
    hp = h_ref.shape[-1]

    @pl.when(pl.program_id(0) == 0)
    def _():
        h_ref[...] = jnp.zeros_like(h_ref)
        c_ref[...] = jnp.zeros_like(c_ref)

    def step(t, carry):
        h, c = carry
        row = pl.multiple_of(t * bp, bp)
        # whh is read from its ref inside the loop (not hoisted into a value)
        # so Mosaic manages the weight loads; MXU accumulates in f32.
        # TODO(synk): on v5e, drive the MXU explicitly (matmul_push_rhs once,
        # matmul_acc_lhs per step) to avoid re-pushing the fixed RHS each step.
        z = zx_ref[pl.ds(row, bp), :].astype(jnp.float32) + jnp.dot(
            h.astype(jnp.bfloat16), whh_ref[...],
            preferred_element_type=jnp.float32)                   # (Bp, 4Hp) f32
        sig = jax.nn.sigmoid(z[:, :3 * hp])      # gates (i, f, o), one EUP stream
        i_g = sig[:, 0 * hp:1 * hp]
        f_g = sig[:, 1 * hp:2 * hp]
        o_g = sig[:, 2 * hp:3 * hp]
        g_g = jnp.tanh(z[:, 3 * hp:])
        c_new = f_g * c + i_g * g_g                               # f32 cell math
        h_new = o_g * jnp.tanh(c_new)
        out_ref[pl.ds(row, bp), :] = h_new.astype(out_ref.dtype)  # aligned bf16 store
        return (h_new, c_new)

    unroll = min(4, tc)  # bounded unroll: LLO visibility without vreg spills
    h_fin, c_fin = lax.fori_loop(0, tc, step, (h_ref[...], c_ref[...]),
                                 unroll=unroll)
    h_ref[...] = h_fin
    c_ref[...] = c_fin


def linear_kernel(x_ref, w_ref, b_ref, out_ref):
    """Output projection tile: (tN, Hp) bf16 @ (Hp, tV) bf16 + (1, tV) f32."""
    out_ref[...] = (
        jnp.dot(x_ref[...], w_ref[...], preferred_element_type=jnp.float32)
        + b_ref[...]
    )


# ------------------------------ JAX wrappers --------------------------------

def run_input_proj(x_flat, w_ih_t, b_row, rows):
    n, e = x_flat.shape
    gh = w_ih_t.shape[1]                                          # 4*Hp
    limit = _vmem_limit_bytes(rows * e * 2, e * gh * 2, gh * 4, rows * gh * 2)
    return pl.pallas_call(
        input_proj_kernel,
        out_shape=jax.ShapeDtypeStruct((n, gh), jnp.bfloat16),
        grid=(n // rows,),
        in_specs=[
            pl.BlockSpec((rows, e), lambda i: (i, 0)),
            pl.BlockSpec((e, gh), lambda i: (0, 0)),
            pl.BlockSpec((1, gh), lambda i: (0, 0)),
        ],
        out_specs=pl.BlockSpec((rows, gh), lambda i: (i, 0)),
        compiler_params=pltpu.CompilerParams(
            dimension_semantics=("parallel",),
            vmem_limit_bytes=limit),
    )(x_flat, w_ih_t, b_row)


def run_lstm(zx_flat, w_hh_t, t_steps, tc, bp):
    n = zx_flat.shape[0]
    hp = w_hh_t.shape[0]
    gh = 4 * hp
    rows = tc * bp
    kernel = functools.partial(lstm_chunk_kernel, tc=tc, bp=bp)
    limit = _vmem_limit_bytes(rows * gh * 2, hp * gh * 2, rows * hp * 2,
                              2 * bp * hp * 4)
    return pl.pallas_call(
        kernel,
        out_shape=jax.ShapeDtypeStruct((n, hp), jnp.bfloat16),
        grid=(t_steps // tc,),
        in_specs=[
            pl.BlockSpec((rows, gh), lambda i: (i, 0)),           # zx chunk streamed
            pl.BlockSpec((hp, gh), lambda i: (0, 0)),             # whh resident
        ],
        out_specs=pl.BlockSpec((rows, hp), lambda i: (i, 0)),     # out chunk streamed
        scratch_shapes=[pltpu.VMEM((bp, hp), jnp.float32),        # h carry
                        pltpu.VMEM((bp, hp), jnp.float32)],       # c carry
        compiler_params=pltpu.CompilerParams(
            dimension_semantics=("arbitrary",),                   # serial recurrence
            vmem_limit_bytes=limit),
    )(zx_flat, w_hh_t)


def run_linear(x_nh, w_hv, b_row):
    n, hp = x_nh.shape
    vp = w_hv.shape[1]
    tn = _pick_tile(n, (512, 256, 128, 64, 32, 16, 8))            # n is a multiple of 8
    tv = _pick_tile(vp, (2048, 1024, 512, 256, 128))              # vp is a multiple of 128
    limit = _vmem_limit_bytes(tn * hp * 2, hp * tv * 2, tv * 4, tn * tv * 4)
    return pl.pallas_call(
        linear_kernel,
        out_shape=jax.ShapeDtypeStruct((n, vp), jnp.float32),
        grid=(n // tn, vp // tv),
        in_specs=[
            pl.BlockSpec((tn, hp), lambda i, j: (i, 0)),
            pl.BlockSpec((hp, tv), lambda i, j: (0, j)),
            pl.BlockSpec((1, tv), lambda i, j: (0, j)),
        ],
        out_specs=pl.BlockSpec((tn, tv), lambda i, j: (i, j)),
        compiler_params=pltpu.CompilerParams(
            dimension_semantics=("parallel", "parallel"),
            vmem_limit_bytes=limit),
    )(x_nh, w_hv, b_row)


def lm_lstm_forward(params, input_ids):
    """input_ids: (B, T) int32 -> logits (B, vocab, T)."""
    v_real = params["V"]
    hp = params["w_hh_t"].shape[0]
    vp = params["w_out_t"].shape[1]

    # Embedding lookup (glue). padding_idx row of the table is zero.
    emb = jnp.take(params["emb_table"], input_ids, axis=0)       # (B, T, E)
    b, t, e = emb.shape
    # dropout1 / dropout2: identity in eval mode.
    # TODO(synk): training-mode dropout would use pltpu.prng_seed/prng_random_bits.

    bp = max(8, _round_up(b, 8))                                  # sublane-dense batch
    # NOTE: padded batch rows compute garbage gates and are sliced off below.
    # TODO(synk): at small B, pack extra real sequences into the padded sublanes.
    tc = _pick_time_chunk(t)

    x_tbe = jnp.transpose(emb, (1, 0, 2))                         # time-major (T, B, E)
    x_tbe = jnp.pad(x_tbe, ((0, 0), (0, bp - b), (0, 0)))
    x_flat = x_tbe.reshape(t * bp, e).astype(jnp.bfloat16)        # (T*Bp, E) bf16

    # Hoisted input projection: data-parallel "parallel" grid (megacore / v7x
    # 2-TC sharding); bf16 zx slab halves its HBM/VMEM footprint.
    zx_flat = run_input_proj(x_flat, params["w_ih_t"], params["b_lstm"],
                             tc * bp)                             # (T*Bp, 4Hp) bf16

    # Serial recurrence, time-chunked; h/c persist in VMEM scratch across chunks.
    h_flat = run_lstm(zx_flat, params["w_hh_t"], t, tc, bp)       # (T*Bp, Hp) bf16

    # No intermediate (B,T,H) transpose: project the time-major slab directly.
    logits_flat = run_linear(h_flat, params["w_out_t"], params["b_out"])   # (T*Bp, Vp)
    logits = logits_flat.reshape(t, bp, vp)[:, :b, :v_real]       # (T, B, V)
    return jnp.transpose(logits, (1, 2, 0))                       # (B, V, T)


# --------------------------- pure-JAX reference ------------------------------

def lm_lstm_reference(ref_params, input_ids):
    """Mirrors the kernel's bf16 quantization points so the tolerance only
    covers accumulation-order / transcendental differences."""
    emb = jnp.take(ref_params["emb_table"], input_ids, axis=0)
    b, t, e = emb.shape
    h_dim = ref_params["w_hh_t"].shape[0]

    x_tbe = jnp.transpose(emb, (1, 0, 2)).astype(jnp.bfloat16).astype(jnp.float32)
    zx = (x_tbe @ ref_params["w_ih_t"] + ref_params["b_lstm"][0]
          ).astype(jnp.bfloat16).astype(jnp.float32)              # (T, B, 4H)

    def step(carry, zx_t):
        h, c = carry
        z = zx_t + h.astype(jnp.bfloat16).astype(jnp.float32) @ ref_params["w_hh_t"]
        i = jax.nn.sigmoid(z[:, 0:h_dim])
        f = jax.nn.sigmoid(z[:, h_dim:2 * h_dim])
        g = jnp.tanh(z[:, 2 * h_dim:3 * h_dim])
        o = jax.nn.sigmoid(z[:, 3 * h_dim:4 * h_dim])
        c = f * c + i * g
        h = o * jnp.tanh(c)
        return (h, c), h

    (_, _), hs = lax.scan(step, (jnp.zeros((b, h_dim)), jnp.zeros((b, h_dim))), zx)
    lstm_out = jnp.transpose(hs, (1, 0, 2)).astype(jnp.bfloat16).astype(jnp.float32)
    logits = lstm_out @ ref_params["w_out_t"] + ref_params["b_out"][0]
    return jnp.transpose(logits, (0, 2, 1))


# --------------------------------- main --------------------------------------

if __name__ == "__main__":
    emb_size, hidden_size, output_size = 16, 32, 64   # E, H, vocab
    pad_index = 0
    B, T = 2, 8

    Hp = _round_up(hidden_size, 128)                  # per-gate lane padding
    Vp = _round_up(output_size, 128)
    # TODO(synk): for H < 128 a packed 4H-in-one-lane-block layout would avoid
    # the 4x padded-lane work; gate-aligned padding is kept because it scales.

    key = jax.random.PRNGKey(0)
    k_emb, k_ih, k_hh, k_bih, k_bhh, k_wo, k_bo, k_ids = jax.random.split(key, 8)

    emb_table = jax.random.normal(k_emb, (output_size, emb_size), jnp.float32)
    emb_table = emb_table.at[pad_index].set(0.0)      # padding_idx row is zero

    k_lstm = 1.0 / jnp.sqrt(hidden_size)
    w_ih = jax.random.uniform(k_ih, (4 * hidden_size, emb_size), jnp.float32,
                              -k_lstm, k_lstm)        # PyTorch weight_ih_l0
    w_hh = jax.random.uniform(k_hh, (4 * hidden_size, hidden_size), jnp.float32,
                              -k_lstm, k_lstm)        # PyTorch weight_hh_l0
    b_ih = jax.random.uniform(k_bih, (4 * hidden_size,), jnp.float32, -k_lstm, k_lstm)
    b_hh = jax.random.uniform(k_bhh, (4 * hidden_size,), jnp.float32, -k_lstm, k_lstm)

    k_lin = 1.0 / jnp.sqrt(hidden_size)
    w_out = jax.random.uniform(k_wo, (output_size, hidden_size), jnp.float32,
                               -k_lin, k_lin)         # PyTorch Linear weight
    b_out = jax.random.uniform(k_bo, (output_size,), jnp.float32, -k_lin, k_lin)

    # bf16-quantized weights feed the MXU; the reference uses the same quantized
    # values (upcast to f32) so the tolerance only covers activation rounding.
    w_ih_bf = jnp.transpose(w_ih).astype(jnp.bfloat16)            # (E, 4H)
    w_hh_bf = jnp.transpose(w_hh).astype(jnp.bfloat16)            # (H, 4H)
    w_out_bf = jnp.transpose(w_out).astype(jnp.bfloat16)          # (H, V)
    b_lstm = (b_ih + b_hh).reshape(1, 4 * hidden_size)            # f32
    b_out_row = b_out.reshape(1, output_size)                     # f32

    params = {
        "emb_table": emb_table,
        # gate-reordered (i,f,o,g) + zero-padded per gate to Hp lanes
        "w_ih_t": _pad_gates(w_ih_bf, hidden_size, Hp),                             # (E, 4Hp)
        "w_hh_t": jnp.pad(_pad_gates(w_hh_bf, hidden_size, Hp),
                          ((0, Hp - hidden_size), (0, 0))),                          # (Hp, 4Hp)
        "b_lstm": _pad_gates(b_lstm, hidden_size, Hp),                               # (1, 4Hp)
        "w_out_t": jnp.pad(w_out_bf, ((0, Hp - hidden_size), (0, Vp - output_size))),  # (Hp, Vp)
        "b_out": jnp.pad(b_out_row, ((0, 0), (0, Vp - output_size))),                # (1, Vp)
        "H": hidden_size, "V": output_size,
    }

    ref_params = {
        "emb_table": emb_table,
        "w_ih_t": w_ih_bf.astype(jnp.float32),
        "w_hh_t": w_hh_bf.astype(jnp.float32),
        "b_lstm": b_lstm,
        "w_out_t": w_out_bf.astype(jnp.float32),
        "b_out": b_out_row,
    }

    input_ids = jax.random.randint(k_ids, (B, T), 0, output_size, jnp.int32)

    out = jax.block_until_ready(lm_lstm_forward(params, input_ids))
    assert out.shape == (B, output_size, T), out.shape

    ref = jax.block_until_ready(lm_lstm_reference(ref_params, input_ids))
    max_err = float(jnp.abs(out - ref).max())
    assert jnp.allclose(out, ref, atol=1e-2, rtol=1e-2), max_err

    print("KERNEL_OK")
</pallas_src>

<mosaic_0001>
module attributes {stable_mosaic.version = 11 : i64} {
  func.func @input_proj_kernel(%arg0: i32, %arg1: memref<32x16xbf16, #tpu.memory_space<vmem>>, %arg2: memref<16x512xbf16, #tpu.memory_space<vmem>>, %arg3: memref<1x512xf32, #tpu.memory_space<vmem>>, %arg4: memref<32x512xbf16, #tpu.memory_space<vmem>>) attributes {dimension_semantics = [#tpu.dimension_semantics<parallel>], iteration_bounds = array<i64: 2>, scalar_prefetch = 0 : i64, scratch_operands = 0 : i64, tpu.core_type = #tpu.core_type<tc>, window_params = [{transform_indices = @transform_0, window_bounds = array<i64: 32, 16>}, {pipeline_mode = #tpu.pipeline_mode<synchronous>, transform_indices = @transform_1, window_bounds = array<i64: 16, 512>}, {pipeline_mode = #tpu.pipeline_mode<synchronous>, transform_indices = @transform_2, window_bounds = array<i64: 1, 512>}, {transform_indices = @transform_3, window_bounds = array<i64: 32, 512>}]} {
    %c0 = arith.constant 0 : index
    %c0_0 = arith.constant 0 : index
    %0 = vector.load %arg1[%c0, %c0_0] : memref<32x16xbf16, #tpu.memory_space<vmem>>, vector<32x16xbf16>
    %c0_1 = arith.constant 0 : index
    %c0_2 = arith.constant 0 : index
    %1 = vector.load %arg2[%c0_1, %c0_2] : memref<16x512xbf16, #tpu.memory_space<vmem>>, vector<16x512xbf16>
    %cst = arith.constant dense<0.000000e+00> : vector<32x512xf32>
    %2 = tpu.matmul %0, %1, %cst {dimension_numbers = #tpu.dot_dimension_numbers<[1], [0], [0], [1], [0, 0, 1, 1], [], []>} : vector<32x16xbf16>, vector<16x512xbf16>, vector<32x512xf32> -> vector<32x512xf32>
    %c0_3 = arith.constant 0 : index
    %c0_4 = arith.constant 0 : index
    %3 = vector.load %arg3[%c0_3, %c0_4] : memref<1x512xf32, #tpu.memory_space<vmem>>, vector<1x512xf32>
    %4 = vector.broadcast %3 : vector<1x512xf32> to vector<32x512xf32>
    %5 = arith.addf %2, %4 : vector<32x512xf32>
    %6 = arith.truncf %5 : vector<32x512xf32> to vector<32x512xbf16>
    %c0_5 = arith.constant 0 : index
    %c0_6 = arith.constant 0 : index
    %7 = vector.load %arg4[%c0_5, %c0_6] : memref<32x512xbf16, #tpu.memory_space<vmem>>, vector<32x512xbf16>
    tpu.vector_store %arg4[%c0_5, %c0_6], %6 {strides = array<i32>} : memref<32x512xbf16, #tpu.memory_space<vmem>>, vector<32x512xbf16>,
    return
  }
  func.func @transform_0(%arg0: i32) -> (i32, i32) {
    %c0_i32 = arith.constant 0 : i32
    %c0_i32_0 = arith.constant 0 : i32
    return %arg0, %c0_i32 : i32, i32
  }
  func.func @transform_1(%arg0: i32) -> (i32, i32) {
    %c0_i32 = arith.constant 0 : i32
    %c0_i32_0 = arith.constant 0 : i32
    %c0_i32_1 = arith.constant 0 : i32
    return %c0_i32, %c0_i32_0 : i32, i32
  }
  func.func @transform_2(%arg0: i32) -> (i32, i32) {
    %c0_i32 = arith.constant 0 : i32
    %c0_i32_0 = arith.constant 0 : i32
    %c0_i32_1 = arith.constant 0 : i32
    return %c0_i32, %c0_i32_0 : i32, i32
  }
  func.func @transform_3(%arg0: i32) -> (i32, i32) {
    %c0_i32 = arith.constant 0 : i32
    %c0_i32_0 = arith.constant 0 : i32
    return %arg0, %c0_i32 : i32, i32
  }
}

</mosaic_0001>

<bundles_post_ra>
// kernel: tpu_custom_call.1
= control target key start
LH: loop header
LB: loop body
LE: loop exit
PB: predicated region body
PF: predicated region fallthrough
CT: control target
= control target key end

     0   :  { %8 = vsyncpa [#allocation3], 0  ;;  %s790_s0 = inlined_call_operand.vmem [shape: bf16[64,16], index: 0, kind: input, shape index: {}]   ;;  %s791_s1 = inlined_call_operand.vmem [shape: bf16[16,512], index: 1, kind: input, shape index: {}]   ;;  %s792_s2 = inlined_call_operand.vmem [shape: f32[1,512], index: 2, kind: input, shape index: {}]   ;;  %s793_s3 = inlined_call_operand.hbm [shape: bf16[64,512], index: 3, kind: output, shape index: {}]  }
   0x1   :  { %10 = vsyncpa [#allocation3 + $0x1], 0  ;;  %s658_s12 = smov 0   ;;  %s660_s13 = smov 0  }
   0x2   :  { %s662_s14 = smov 0   ;;  %s664_s15 = smov 0  }
   0x3 LB: > { %s679_s16 = sadd.s32 4294967295, %s632_s15   ;;  %s479_s17 = sadd.s32 4294967294, %s632_s15   ;;  %s632_s15 = sphi %s664_s15, %s799_s15   ;;  %s628_s14 = sphi %s662_s14, %s798_s14   ;;  %s624_s13 = sphi %s660_s13, %s797_s13   ;;  %s620_s12 = sphi %s658_s12, %s796_s12  }
   0x4   : > { %s683_s18 = sadd.s32 1, %s632_s15   ;;  %s91_s19 = sadd.s32 1, %s628_s14 }
   0x5   : > { %s88_s20 = ssub.s32 %s632_s15, %s683_s18  ;;  %p101_p0 = scmp.ne.s32.totalorder %s628_s14, %s624_s13 }
   0x6   : > { %p89_p1 = scmp.eq.s32.totalorder %s88_s20, 0  ;;  %p102_p2 = scmp.eq.s32.totalorder %s679_s16, 1 }
   0x7   : > { %p107_p3 = scmp.ne.s32.totalorder %s624_s13, %s620_s12  ;;  %p108_p4 = scmp.eq.s32.totalorder %s479_s17, 1 }
   0x8   : > { %s694_s21 = scalar_select %p89_p1, %s628_s14, %s91_s19  }
   0x9   : > { %p696_p5 = por %p102_p2, %p101_p0  ;;  %p700_p6 = por %p108_p4, %p107_p3 }
   0xa   : > { %p482_p7 = scmp.ge.s32.totalorder %s632_s15, 1  ;;  %p141_p8 = scmp.lt.s32.totalorder %s632_s15, 3 }
   0xc   : > { %p142_p9 = pnand %p482_p7, %p141_p8 }
   0xd   : > { %v562_v0 = vld [vmem:[%s791_s1 + $0x4] ss:$16 sps:$4 sm:$0xff] (!%p142_p9)   ;;  %s484_s26 = sshll.u32 (!%p142_p9), %s679_s16, 2  ;;  %v564_v1 = vld [vmem:[%s791_s1 + $0xc] ss:$16 sps:$4 sm:$0xff] (!%p142_p9)   ;;  %v634_v2 = vmov (!%p142_p9), 0   ;;  %v183_v7 = vlaneseq (!%p142_p9) }
   0xe   : > { %145 = sbr.rel (%p142_p9) target bundleno = 267 (0x10b), region = 32  ;;  %272 = vmatprep.mubr.bf16.mxu0 (!%p142_p9), %v634_v2  ;;  %325 = vmatprep.mubr.bf16.mxu1 (!%p142_p9), %v634_v2  ;;  %p166_p10 = scmp.lt.s32.totalorder (!%p142_p9), %s484_s26, 7  ;;  %v566_v3 = vld [vmem:[%s791_s1] ss:$16 sps:$4 sm:$0xff] (!%p142_p9)   ;;  %v567_v4 = vld [vmem:[%s791_s1 + $0x8] ss:$16 sps:$4 sm:$0xff] (!%p142_p9)  }
   0xf   : > { %240 = vmatprep.subr.bf16.mxu0 (!%p142_p9), %v562_v0  ;;  %293 = vmatprep.subr.bf16.mxu1 (!%p142_p9), %v564_v1  ;;  %vm233_vm0 = vcmask (!%p142_p9), 130048   ;;  %v184_v8 = vshrl.u32 (!%p142_p9), %v183_v7, 7  ;;  %v181_v11 = vld [vmem:[%s792_s2] sm:$0xf] (!%p142_p9)  ;;  %s162_s17 = sand.u32 (!%p142_p9), 1, %s624_s13   ;;  %s519_s24 = sshll.u32 (!%p142_p9), %s679_s16, 10 }
  0x10   : > { %241 = vmatpush1.bf16.msra.mxu0 (!%p142_p9), %v566_v3  ;;  %294 = vmatpush1.bf16.msra.mxu1 (!%p142_p9), %v567_v4  ;;  %s483_s19 = sshll.u32 (!%p142_p9), %s162_s17, 6  ;;  %s739_s28 = scalar_lea.hbm (!%p142_p9), %s793_s3, %s519_s24 }
  0x11   : > { %v185_v9 = vsub.s32 (!%p142_p9), 0, %v184_v8  ;;  %v193_v10 = vsub.s32 (!%p142_p9), 2, %v184_v8  ;;  %v189_v12 = vsub.s32 (!%p142_p9), 1, %v184_v8  ;;  %v197_v13 = vsub.s32 (!%p142_p9), 3, %v184_v8  ;;  %s728_s20 = scalar_lea.vmem (!%p142_p9), [#allocation2], %s483_s19  ;;  %s749_s16 = scalar_lea.sflag (!%p142_p9), [#allocation3], %s162_s17 }
  0x12   : > { %s417_s25 = sshll.u32 (!%p142_p9), %s728_s20, 4  ;;  %s635_s30 = smov (!%p142_p9), [#allocation2]   ;;  %s741_s25 = int_to_ptr.vmem [resolvable:$true] %s417_s25 }
  0x13   : > { %v186_v14 = vrot.slane (!%p142_p9), %v181_v11, %v185_v9  ;;  %v194_v15 = vrot.slane (!%p142_p9), %v181_v11, %v193_v10  ;;  %v190_v16 = vrot.slane (!%p142_p9), %v181_v11, %v189_v12  ;;  %v198_v17 = vrot.slane (!%p142_p9), %v181_v11, %v197_v13  ;;  %s570_s29 = scalar_lea.vmem (!%p142_p9), %s741_s25, 1024  ;;  %s574_s4 = sshll.u32 (!%p142_p9), %s635_s30, 4  ;;  %s575_s4 = int_to_ptr.vmem [resolvable:$false] %s574_s4 }
  0x14   : > { %p571_p11 = scmp.ne.s32.totalorder (!%p142_p9), %s741_s25, %s570_s29  ;;  %s576_s5 = scalar_lea.vmem (!%p142_p9), %s575_s4, 2048 }
  0x15   : > { %s801_s26 = smov (!%p166_p10, %s484_s26), 7  ;;  %p577_p0 = scmp.lt.s32.totalorder %s741_s25, %s575_s4 }
  0x16   : > { %s485_s6 = sshll.u32 %s801_s26, 2  ;;  %p572_p12 = pnand %p571_p11, %p696_p5 }
  0x17   : > { %s169_s9 = scalar_lea.vmem %s790_s0, %s485_s6  ;;  %p578_p1 = scmp.lt.s32.totalorder %s576_s5, %s570_s29 }
  0x18   : > { %v568_v5 = vld [vmem:[%s169_s9] sm:$0xff]   ;;  %v569_v6 = vld [vmem:[%s169_s9 + $0x8] sm:$0xff]   ;;  %p573_p13 = pneg %p572_p12 }
  0x19   : > { %492 = vmatmul.mubr.msk.bf16.vlgmr.msra.gmra.mrb[0].mxu0 %vm233_vm0, %v568_v5  ;;  %494 = vmatmul.mubr.msk.bf16.vlgmr.msra.gmra.mrb[0].mxu1 %vm233_vm0, %v568_v5  ;;  %p579_p2 = por %p578_p1, %p577_p0 }
  0x1a   : > { %282 = vmatprep.mubr.bf16.mxu0 %v634_v2  ;;  %335 = vmatprep.mubr.bf16.mxu1 %v634_v2 }
  0x1b   : > { %p580_p3 = pnand %p579_p2, %p573_p13 }
  0x21   : > { %493 = vmatmul.mubr.msk.bf16.gmra.mrb[4].mxu0 %vm233_vm0, %v569_v6  ;;  %495 = vmatmul.mubr.msk.bf16.gmra.mrb[4].mxu1 %vm233_vm0, %v569_v6 }
  0xec   : > { %v274_v18 = vpop.f32.mrb[0].mxu0  ;;  %v327_v19 = vpop.f32.mrb[0].mxu1 }
  0xed   : > { %v275_v20 = vadd.f32 %v274_v18, %v186_v14  ;;  %v328_v21 = vadd.f32 %v327_v19, %v194_v15  ;;  %v276_v22 = vpop.f32.mrb[1].mxu0  ;;  %v329_v23 = vpop.f32.mrb[1].mxu1 }
  0xee   : > { %v277_v24 = vadd.f32 %v276_v22, %v190_v16  ;;  %v330_v25 = vadd.f32 %v329_v23, %v198_v17  ;;  %v278_v26 = vpop.f32.mrb[2].mxu0  ;;  %v331_v27 = vpop.f32.mrb[2].mxu1 }
  0xef   : > { %v279_v28 = vadd.f32 %v278_v26, %v186_v14  ;;  %v332_v29 = vadd.f32 %v331_v27, %v194_v15  ;;  %v280_v30 = vpop.f32.mrb[3].mxu0  ;;  %v333_v31 = vpop.f32.mrb[3].mxu1 }
  0xf0   : > { %v510_v32 = vpack.c.bf16 %v277_v24, %v275_v20  ;;  %v511_v33 = vpack.c.bf16 %v330_v25, %v328_v21  ;;  %v281_v34 = vadd.f32 %v280_v30, %v190_v16  ;;  %v334_v35 = vadd.f32 %v333_v31, %v198_v17 }
  0xf2   : > { %394 = vst [vmem:[%s728_s20] sm:$0xff] %v510_v32  ;;  %395 = vst [vmem:[%s728_s20 + $0x8] sm:$0xff] %v511_v33  ;;  %v512_v36 = vpack.c.bf16 %v281_v34, %v279_v28  ;;  %v513_v37 = vpack.c.bf16 %v334_v35, %v332_v29 }
  0xf4   : > { %396 = vst [vmem:[%s728_s20 + $0x10] sm:$0xff] %v512_v36  ;;  %397 = vst [vmem:[%s728_s20 + $0x18] sm:$0xff] %v513_v37  ;;  %v284_v38 = vpop.f32.mrb[4].mxu0  ;;  %v337_v39 = vpop.f32.mrb[4].mxu1 }
  0xf5   : > { %v285_v40 = vadd.f32 %v284_v38, %v186_v14  ;;  %v338_v41 = vadd.f32 %v337_v39, %v194_v15  ;;  %v286_v42 = vpop.f32.mrb[5].mxu0  ;;  %v339_v43 = vpop.f32.mrb[5].mxu1 }
  0xf6   : > { %v287_v44 = vadd.f32 %v286_v42, %v190_v16  ;;  %v340_v45 = vadd.f32 %v339_v43, %v198_v17  ;;  %v288_v46 = vpop.f32.mrb[6].mxu0  ;;  %v341_v47 = vpop.f32.mrb[6].mxu1 }
  0xf7   : > { %v289_v48 = vadd.f32 %v288_v46, %v186_v14  ;;  %v342_v49 = vadd.f32 %v341_v47, %v194_v15  ;;  %v290_v50 = vpop.f32.mrb[7].mxu0  ;;  %v343_v51 = vpop.f32.mrb[7].mxu1 }
  0xf8   : > { %v514_v52 = vpack.c.bf16 %v287_v44, %v285_v40  ;;  %v515_v53 = vpack.c.bf16 %v340_v45, %v338_v41  ;;  %v291_v54 = vadd.f32 %v290_v50, %v190_v16  ;;  %v344_v55 = vadd.f32 %v343_v51, %v198_v17 }
  0xfa   : > { %398 = vst [vmem:[%s728_s20 + $0x20] sm:$0xff] %v514_v52  ;;  %399 = vst [vmem:[%s728_s20 + $0x28] sm:$0xff] %v515_v53  ;;  %v516_v56 = vpack.c.bf16 %v291_v54, %v289_v48  ;;  %v517_v57 = vpack.c.bf16 %v344_v55, %v342_v49 }
  0xfc   : > { %400 = vst [vmem:[%s728_s20 + $0x30] sm:$0xff] %v516_v56  ;;  %401 = vst [vmem:[%s728_s20 + $0x38] sm:$0xff] %v517_v57 }
  0xfd   : > { %583 = shalt.err (!%p580_p3)
}
  0xfe   : > { %s584_s6 = scalar_lea.hbm %s739_s28, 1024  ;;  %s588_s9 = scalar_lea.hbm %s793_s3, 2048 }
  0xff   : > { %p585_p4 = scmp.ne.s32.totalorder %s739_s28, %s584_s6  ;;  %p589_p9 = scmp.lt.u32.totalorder %s739_s28, %s793_s3 }
 0x100   : > { %p590_p10 = scmp.lt.u32.totalorder %s588_s9, %s584_s6  ;;  %p592_p12 = scmp.lt.u32.totalorder %s584_s6, %s739_s28 }
 0x101   : > { %p586_p7 = pnand %p585_p4, %p696_p5 }
 0x102   : > { %p591_p11 = por %p590_p10, %p589_p9 }
 0x103   : > { %p587_p8 = pneg %p586_p7 }
 0x104   : > { %p593_p13 = por %p592_p12, %p591_p11 }
 0x106   : > { %p594_p0 = pnand %p593_p13, %p587_p8 }
 0x108   : > { %597 = shalt.err (!%p594_p0)
}
 0x109   : > { %s636_s17 = smov 256   ;;  %s637_s19 = smov 16  }
 0x10a   : > { %520 = dma.vmem_to_hbm [thread:$0]  (%p696_p5), %s741_s25, 1024, %s739_s28, %s749_s16, %s636_s17, %s636_s17, %s637_s19  }
 0x10b PF: > { %p526_p1 = scmp.ge.s32.totalorder %s632_s15, 2  ;;  %s432_s20 = sand.u32 1, %s620_s12  }
 0x10c   : > { %s433_s24 = scalar_lea.sflag [#allocation3], %s432_s20 }
 0x10d   : > { %p523_p2 = pnand %p526_p1, %p700_p6 }
 0x10f   : > { %615 = dma.done.wait (!%p523_p2), %s433_s24, 1024  }
 0x110   : > { %617 = vsyncadd (!%p523_p2), %s433_s24, 4294966272  ;;  %p13_p3 = scmp.ge.s32.totalorder %s683_s18, 4   ;;  %s796_s12 = smov %s624_s13 }
 0x111   : > { %s797_s13 = smov %s628_s14  ;;  %s798_s14 = smov %s694_s21 }
 0x112   : > { %s799_s15 = smov %s683_s18  ;;  %15 = sbr.rel (!%p13_p3) target bundleno = 3 (0x3), region = 67 }
 0x119   :  { %438 = vsyncpa [#allocation3], 1 }
 0x11a   :  { %440 = vsyncpa [#allocation3 + $0x1], 1 }

</bundles_post_ra>
